<compile_context>
chip_gen: v7x
topology: tpu7x:2x2x1
jax: 0.10.0
libtpu: 0.0.40
codegen_flags: <defaults>
</compile_context>

<pallas_src>
import jax
import jax.numpy as jnp
import numpy as np
from jax.experimental import pallas as pl
from jax.experimental.pallas import tpu as pltpu


def critic_kernel(x_ref, wcat_ref, b1_ref, w2s_ref, b2_ref, w3_ref, b3_ref,
                  out_ref):
    H1 = b1_ref.shape[-1]

    # Fused layer-1 + action branch:  [state|action] @ blockdiag(W1, W2a)
    #   -> lanes [0:H1)      = state @ W1
    #   -> lanes [H1:H1+H2)  = action @ W2a
    # bf16 operands, f32 accumulation.
    y = jnp.dot(x_ref[...], wcat_ref[...],
                preferred_element_type=jnp.float32)            # (TB, H1+H2) f32

    xs = jnp.maximum(y[:, :H1] + b1_ref[...], 0.0)             # (TB, H1) f32
    act_term = y[:, H1:]                                       # (TB, H2) f32

    # Layer 2: xs @ W2s + (action @ W2a) + b2, ReLU.  bf16 MXU, f32 elementwise.
    h = jnp.dot(xs.astype(jnp.bfloat16), w2s_ref[...],
                preferred_element_type=jnp.float32)
    h = jnp.maximum(h + act_term + b2_ref[...], 0.0)           # (TB, H2) f32

    # Output layer as VPU multiply + lane reduction (w3 stored as (1, H2) row).
    q = jnp.sum(h * w3_ref[...], axis=-1) + b3_ref[0]          # (TB,) f32

    # Lane-dense store: one full-width (1, TB) row per grid step.
    out_ref[...] = q[None, :].astype(out_ref.dtype)


def _choose_batch_tile(B, max_tile):
    """Pick (TB, Bp): lane-aligned batch tile and padded batch size."""
    if B < 256:
        return B, B                          # single tile, grid of 1
    # >=2 tiles so v7x's two TensorCores both get work; cap at max_tile.
    n_tiles = max(2, pl.cdiv(B, max_tile))
    TB = pl.cdiv(pl.cdiv(B, n_tiles), 128) * 128
    TB = min(TB, max_tile)
    Bp = pl.cdiv(B, TB) * TB
    return TB, Bp


def critic_forward(state, action, params, *, max_tile=8192):
    """Fused critic forward.  state: (B, S), action: (B, A)  ->  (B, 1)."""
    w1, b1, w2s, w2a, b2, w3, b3 = params
    state = state.astype(jnp.float32)
    action = action.astype(jnp.float32)
    B, S = state.shape
    A = action.shape[1]
    H1 = w1.shape[1]
    H2 = w2s.shape[1]

    # Kernel-layout params: block-diagonal fused first weight, bf16 MXU operands.
    wcat = jnp.zeros((S + A, H1 + H2), jnp.float32)
    wcat = wcat.at[:S, :H1].set(w1)
    wcat = wcat.at[S:, H1:].set(w2a)
    wcat_bf16 = wcat.astype(jnp.bfloat16)
    w2s_bf16 = w2s.astype(jnp.bfloat16)

    if max_tile >= 256:
        assert max_tile % 128 == 0, "batch tile must be lane-aligned"
    TB, Bp = _choose_batch_tile(B, max_tile)

    # Streamed input: concat state/action once in the wrapper, halve bytes (bf16).
    x = jnp.concatenate([state, action], axis=1)               # (B, S+A)
    pad = Bp - B
    if pad:
        x = jnp.pad(x, ((0, pad), (0, 0)))
    x = x.astype(jnp.bfloat16)

    def resident(a):
        # Whole array, constant block index -> stays in VMEM across the grid.
        nd = a.ndim
        return pl.BlockSpec(a.shape, lambda i: (0,) * nd)

    out_row = pl.pallas_call(
        critic_kernel,
        out_shape=jax.ShapeDtypeStruct((1, Bp), jnp.float32),
        grid=(Bp // TB,),
        in_specs=[
            pl.BlockSpec((TB, S + A), lambda i: (i, 0)),   # streamed input tile
            resident(wcat_bf16), resident(b1),
            resident(w2s_bf16), resident(b2),
            resident(w3),
            pl.BlockSpec(memory_space=pltpu.SMEM),         # b3 scalar in SMEM
        ],
        out_specs=pl.BlockSpec((1, TB), lambda i: (0, i)),  # lane-dense output row
        compiler_params=pltpu.CompilerParams(
            dimension_semantics=("parallel",),             # batch tiles -> both v7x TCs
            vmem_limit_bytes=32 * 1024 * 1024,
        ),
    )(x, wcat_bf16, b1, w2s_bf16, b2, w3, b3)

    return out_row.reshape(Bp, 1)[:B]


def init_critic_params(key, state_size, action_size, layers=(64, 64)):
    """Deterministic synthetic init mirroring the module's reset_parameters().

    hidden_init quirk: fan_in = weight.size()[0] = OUT features (PyTorch weight
    layout is (out, in)); faithfully reproduced.  Out layer uses +/-0.003.
    Biases use PyTorch's default Linear init U(-1/sqrt(in), 1/sqrt(in)).
    Kernel weight layout is (in_features, out_features); W3 stored as a row.
    """
    h1, h2 = layers
    ks = jax.random.split(key, 6)

    def u(k, shape, lim):
        return jax.random.uniform(k, shape, jnp.float32, -lim, lim)

    w1 = u(ks[0], (state_size, h1), 1.0 / np.sqrt(h1))
    b1 = u(ks[1], (1, h1), 1.0 / np.sqrt(state_size))

    w2 = u(ks[2], (h1 + action_size, h2), 1.0 / np.sqrt(h2))
    w2s, w2a = w2[:h1], w2[h1:]          # split realizes the concat in-kernel
    b2 = u(ks[3], (1, h2), 1.0 / np.sqrt(h1 + action_size))

    w3 = u(ks[4], (1, h2), 0.003)        # row form for the in-kernel VPU reduce
    b3 = u(ks[5], (1,), 1.0 / np.sqrt(h2))

    return (w1, b1, w2s, w2a, b2, w3, b3)


def critic_reference(state, action, params):
    """Pure-JAX f32 reference for correctness checks."""
    w1, b1, w2s, w2a, b2, w3, b3 = params
    xs = jnp.maximum(state @ w1 + b1, 0.0)
    x = jnp.concatenate([xs, action], axis=1)
    w2 = jnp.concatenate([w2s, w2a], axis=0)
    h = jnp.maximum(x @ w2 + b2, 0.0)
    return h @ w3.T + b3[None, :]


# TODO(synk): batch_norm=True path (BatchNorm1d after layer 1) not implemented;
# the default batch_norm=False forward is what this kernel covers.


if __name__ == "__main__":
    key = jax.random.PRNGKey(0)
    k_state, k_action, k_params, k_big = jax.random.split(key, 4)

    B, STATE, ACTION = 8, 16, 4
    params = init_critic_params(k_params, STATE, ACTION, layers=(64, 64))

    # Small single-tile check (whole batch in one grid step).
    state = jax.random.normal(k_state, (B, STATE), jnp.float32)
    action = jax.random.normal(k_action, (B, ACTION), jnp.float32)
    q = critic_forward(state, action, params)
    jax.block_until_ready(q)
    # Tolerances account for bf16 MXU operands (f32 accumulation).
    np.testing.assert_allclose(
        np.asarray(q), np.asarray(critic_reference(state, action, params)),
        rtol=2e-2, atol=1e-2)
    assert q.shape == (B, 1)

    # Multi-tile check exercising the pipelined, parallel batch grid
    # (256 rows split into 2 x 128-row tiles, lane-dense (1,128) output stores).
    kb1, kb2 = jax.random.split(k_big)
    Bt = 256
    state_t = jax.random.normal(kb1, (Bt, STATE), jnp.float32)
    action_t = jax.random.normal(kb2, (Bt, ACTION), jnp.float32)
    q_t = critic_forward(state_t, action_t, params, max_tile=128)
    jax.block_until_ready(q_t)
    np.testing.assert_allclose(
        np.asarray(q_t), np.asarray(critic_reference(state_t, action_t, params)),
        rtol=2e-2, atol=1e-2)
    assert q_t.shape == (Bt, 1)

    print("KERNEL_OK")
</pallas_src>

<mosaic_0001>
module attributes {stable_mosaic.version = 11 : i64} {
  func.func @critic_kernel(%arg0: i32, %arg1: memref<8x20xbf16, #tpu.memory_space<vmem>>, %arg2: memref<20x128xbf16, #tpu.memory_space<vmem>>, %arg3: memref<1x64xf32, #tpu.memory_space<vmem>>, %arg4: memref<64x64xbf16, #tpu.memory_space<vmem>>, %arg5: memref<1x64xf32, #tpu.memory_space<vmem>>, %arg6: memref<1x64xf32, #tpu.memory_space<vmem>>, %arg7: memref<1xf32, #tpu.memory_space<smem>>, %arg8: memref<1x8xf32, #tpu.memory_space<vmem>>) attributes {dimension_semantics = [#tpu.dimension_semantics<parallel>], iteration_bounds = array<i64: 1>, scalar_prefetch = 0 : i64, scratch_operands = 0 : i64, tpu.core_type = #tpu.core_type<tc>, window_params = [{transform_indices = @transform_0, window_bounds = array<i64: 8, 20>}, {pipeline_mode = #tpu.pipeline_mode<synchronous>, transform_indices = @transform_1, window_bounds = array<i64: 20, 128>}, {pipeline_mode = #tpu.pipeline_mode<synchronous>, transform_indices = @transform_2, window_bounds = array<i64: 1, 64>}, {pipeline_mode = #tpu.pipeline_mode<synchronous>, transform_indices = @transform_3, window_bounds = array<i64: 64, 64>}, {pipeline_mode = #tpu.pipeline_mode<synchronous>, transform_indices = @transform_4, window_bounds = array<i64: 1, 64>}, {pipeline_mode = #tpu.pipeline_mode<synchronous>, transform_indices = @transform_5, window_bounds = array<i64: 1, 64>}, {transform_indices = @transform_6, window_bounds = array<i64: 1>}, {transform_indices = @transform_7, window_bounds = array<i64: 1, 8>}]} {
    %c0 = arith.constant 0 : index
    %c0_0 = arith.constant 0 : index
    %0 = vector.load %arg1[%c0, %c0_0] : memref<8x20xbf16, #tpu.memory_space<vmem>>, vector<8x20xbf16>
    %c0_1 = arith.constant 0 : index
    %c0_2 = arith.constant 0 : index
    %1 = vector.load %arg2[%c0_1, %c0_2] : memref<20x128xbf16, #tpu.memory_space<vmem>>, vector<20x128xbf16>
    %cst = arith.constant dense<0.000000e+00> : vector<8x128xf32>
    %2 = tpu.matmul %0, %1, %cst {dimension_numbers = #tpu.dot_dimension_numbers<[1], [0], [0], [1], [0, 0, 1, 1], [], []>} : vector<8x20xbf16>, vector<20x128xbf16>, vector<8x128xf32> -> vector<8x128xf32>
    %3 = vector.extract_strided_slice %2 {offsets = [0, 0], sizes = [8, 64], strides = [1, 1]} : vector<8x128xf32> to vector<8x64xf32>
    %c0_3 = arith.constant 0 : index
    %c0_4 = arith.constant 0 : index
    %4 = vector.load %arg3[%c0_3, %c0_4] : memref<1x64xf32, #tpu.memory_space<vmem>>, vector<1x64xf32>
    %5 = vector.broadcast %4 : vector<1x64xf32> to vector<8x64xf32>
    %6 = arith.addf %3, %5 : vector<8x64xf32>
    %cst_5 = arith.constant 0.000000e+00 : f32
    %7 = vector.broadcast %cst_5 : f32 to vector<8x64xf32>
    %8 = arith.maximumf %6, %7 : vector<8x64xf32>
    %9 = vector.extract_strided_slice %2 {offsets = [0, 64], sizes = [8, 64], strides = [1, 1]} : vector<8x128xf32> to vector<8x64xf32>
    %10 = arith.truncf %8 : vector<8x64xf32> to vector<8x64xbf16>
    %c0_6 = arith.constant 0 : index
    %c0_7 = arith.constant 0 : index
    %11 = vector.load %arg4[%c0_6, %c0_7] : memref<64x64xbf16, #tpu.memory_space<vmem>>, vector<64x64xbf16>
    %cst_8 = arith.constant dense<0.000000e+00> : vector<8x64xf32>
    %12 = tpu.matmul %10, %11, %cst_8 {dimension_numbers = #tpu.dot_dimension_numbers<[1], [0], [0], [1], [0, 0, 1, 1], [], []>} : vector<8x64xbf16>, vector<64x64xbf16>, vector<8x64xf32> -> vector<8x64xf32>
    %13 = arith.addf %12, %9 : vector<8x64xf32>
    %c0_9 = arith.constant 0 : index
    %c0_10 = arith.constant 0 : index
    %14 = vector.load %arg5[%c0_9, %c0_10] : memref<1x64xf32, #tpu.memory_space<vmem>>, vector<1x64xf32>
    %15 = vector.broadcast %14 : vector<1x64xf32> to vector<8x64xf32>
    %16 = arith.addf %13, %15 : vector<8x64xf32>
    %cst_11 = arith.constant 0.000000e+00 : f32
    %17 = vector.broadcast %cst_11 : f32 to vector<8x64xf32>
    %18 = arith.maximumf %16, %17 : vector<8x64xf32>
    %c0_12 = arith.constant 0 : index
    %c0_13 = arith.constant 0 : index
    %19 = vector.load %arg6[%c0_12, %c0_13] : memref<1x64xf32, #tpu.memory_space<vmem>>, vector<1x64xf32>
    %20 = vector.broadcast %19 : vector<1x64xf32> to vector<8x64xf32>
    %21 = arith.mulf %18, %20 : vector<8x64xf32>
    %cst_14 = arith.constant dense<0.000000e+00> : vector<8xf32>
    %22 = vector.multi_reduction <add>, %21, %cst_14 [1] : vector<8x64xf32> to vector<8xf32>
    %c0_15 = arith.constant 0 : index
    %23 = memref.load %arg7[%c0_15] : memref<1xf32, #tpu.memory_space<smem>>
    %24 = vector.broadcast %23 : f32 to vector<8xf32>
    %25 = arith.addf %22, %24 : vector<8xf32>
    %26 = vector.shape_cast %25 : vector<8xf32> to vector<1x8xf32>
    %c0_16 = arith.constant 0 : index
    %c0_17 = arith.constant 0 : index
    %27 = vector.load %arg8[%c0_16, %c0_17] : memref<1x8xf32, #tpu.memory_space<vmem>>, vector<1x8xf32>
    tpu.vector_store %arg8[%c0_16, %c0_17], %26 {strides = array<i32>} : memref<1x8xf32, #tpu.memory_space<vmem>>, vector<1x8xf32>,
    return
  }
  func.func @transform_0(%arg0: i32) -> (i32, i32) {
    %c0_i32 = arith.constant 0 : i32
    %c0_i32_0 = arith.constant 0 : i32
    return %arg0, %c0_i32 : i32, i32
  }
  func.func @transform_1(%arg0: i32) -> (i32, i32) {
    %c0_i32 = arith.constant 0 : i32
    %c0_i32_0 = arith.constant 0 : i32
    %c0_i32_1 = arith.constant 0 : i32
    return %c0_i32, %c0_i32_0 : i32, i32
  }
  func.func @transform_2(%arg0: i32) -> (i32, i32) {
    %c0_i32 = arith.constant 0 : i32
    %c0_i32_0 = arith.constant 0 : i32
    %c0_i32_1 = arith.constant 0 : i32
    return %c0_i32, %c0_i32_0 : i32, i32
  }
  func.func @transform_3(%arg0: i32) -> (i32, i32) {
    %c0_i32 = arith.constant 0 : i32
    %c0_i32_0 = arith.constant 0 : i32
    %c0_i32_1 = arith.constant 0 : i32
    return %c0_i32, %c0_i32_0 : i32, i32
  }
  func.func @transform_4(%arg0: i32) -> (i32, i32) {
    %c0_i32 = arith.constant 0 : i32
    %c0_i32_0 = arith.constant 0 : i32
    %c0_i32_1 = arith.constant 0 : i32
    return %c0_i32, %c0_i32_0 : i32, i32
  }
  func.func @transform_5(%arg0: i32) -> (i32, i32) {
    %c0_i32 = arith.constant 0 : i32
    %c0_i32_0 = arith.constant 0 : i32
    %c0_i32_1 = arith.constant 0 : i32
    return %c0_i32, %c0_i32_0 : i32, i32
  }
  func.func @transform_6(%arg0: i32) -> i32 {
    %c0_i32 = arith.constant 0 : i32
    %c0_i32_0 = arith.constant 0 : i32
    return %c0_i32 : i32
  }
  func.func @transform_7(%arg0: i32) -> (i32, i32) {
    %c0_i32 = arith.constant 0 : i32
    %c0_i32_0 = arith.constant 0 : i32
    return %c0_i32, %arg0 : i32, i32
  }
}

</mosaic_0001>

<bundles_post_ra>
// kernel: tpu_custom_call.1
= control target key start
LH: loop header
LB: loop body
LE: loop exit
PB: predicated region body
PF: predicated region fallthrough
CT: control target
= control target key end

     0   :  { %13 = vsyncpa [#allocation4], 0  ;;  %s530_s0 = inlined_call_operand.hbm [shape: bf16[8,20], index: 0, kind: input, shape index: {}]   ;;  %s531_s1 = inlined_call_operand.hbm [shape: bf16[20,128], index: 1, kind: input, shape index: {}]   ;;  %s532_s2 = inlined_call_operand.vmem [shape: f32[1,64], index: 2, kind: input, shape index: {}]   ;;  %s533_s3 = inlined_call_operand.hbm [shape: bf16[64,64], index: 3, kind: input, shape index: {}]   ;;  %s534_s4 = inlined_call_operand.vmem [shape: f32[1,64], index: 4, kind: input, shape index: {}]   ;;  %s535_s5 = inlined_call_operand.vmem [shape: f32[1,64], index: 5, kind: input, shape index: {}]   ;;  %s536_s6 = inlined_call_operand.<no memory space> [shape: f32[1], index: 6, kind: input, shape index: {}]   ;;  %s537_s7 = inlined_call_operand.hbm [shape: f32[1,8], index: 7, kind: output, shape index: {}]  }
   0x1   :  { %14 = vsyncpa [#allocation7], 0 }
   0x2   :  { %15 = vsyncpa [#allocation5], 0  ;;  %s415_s24 = smov [#allocation6]   ;;  %s321_s28 = scalar_lea.hbm %s531_s1, 192 }
   0x3   :  { %s31_s25 = sshll.u32 %s415_s24, 4  ;;  %p322_p0 = scmp.ne.s32.totalorder %s531_s1, %s321_s28  ;;  %s32_s25 = int_to_ptr.vmem [resolvable:$true] %s31_s25 }
   0x4   :  { %p325_p1 = scmp.lt.u32.totalorder %s321_s28, %s531_s1 }
   0x6   :  { %p327_p2 = pnand %p325_p1, %p322_p0 }
   0x8   :  { %330 = shalt.err (!%p327_p2)
}
   0x9   :  { %s331_s10 = scalar_lea.vmem %s32_s25, 192  ;;  %p336_p4 = scmp.lt.s32.totalorder %s32_s25, %s32_s25 }
   0xa   :  { %p332_p3 = scmp.ne.s32.totalorder %s32_s25, %s331_s10  ;;  %p337_p5 = scmp.lt.s32.totalorder %s331_s10, %s331_s10 }
   0xc   :  { %p338_p6 = por %p337_p5, %p336_p4 }
   0xe   :  { %p339_p7 = pnand %p338_p6, %p332_p3 }
  0x10   :  { %342 = shalt.err (!%p339_p7)
}
  0x11   :  { %s416_s11 = smov 64   ;;  %s417_s12 = smov 4  }
  0x12   :  { %37 = dma.hbm_to_vmem [thread:$0]  %s531_s1, 192, %s32_s25, [#allocation7], %s416_s11, %s416_s11, %s417_s12  }
  0x13   :  { %s418_s15 = smov [#allocation3]   ;;  %s419_s17 = smov [#allocation8]  }
  0x14   :  { %s22_s16 = sshll.u32 %s418_s15, 4  ;;  %s45_s18 = sshll.u32 %s419_s17, 4  ;;  %s23_s16 = int_to_ptr.vmem [resolvable:$true] %s22_s16  ;;  %s46_s18 = int_to_ptr.vmem [resolvable:$true] %s45_s18 }
  0x15   :  { %s343_s21 = scalar_lea.hbm %s530_s0, 64 }
  0x16   :  { %p344_p8 = scmp.ne.s32.totalorder %s530_s0, %s343_s21  ;;  %p347_p9 = scmp.lt.u32.totalorder %s343_s21, %s530_s0 }
  0x18   :  { %p349_p10 = pnand %p347_p9, %p344_p8 }
  0x1a   :  { %352 = shalt.err (!%p349_p10)
}
  0x1b   :  { %s353_s1 = scalar_lea.vmem %s23_s16, 64  ;;  %p358_p12 = scmp.lt.s32.totalorder %s23_s16, %s23_s16 }
  0x1c   :  { %p354_p11 = scmp.ne.s32.totalorder %s23_s16, %s353_s1  ;;  %p359_p13 = scmp.lt.s32.totalorder %s353_s1, %s353_s1 }
  0x1e   :  { %p360_p0 = por %p359_p13, %p358_p12 }
  0x20   :  { %p361_p1 = pnand %p360_p0, %p354_p11 }
  0x22   :  { %364 = shalt.err (!%p361_p1)
}
  0x23   :  { %25 = dma.hbm_to_vmem [thread:$0]  %s530_s0, 64, %s23_s16, [#allocation4]  }
  0x24   :  { %s365_s30 = scalar_lea.hbm %s533_s3, 512 }
  0x25   :  { %p366_p2 = scmp.ne.s32.totalorder %s533_s3, %s365_s30  ;;  %p369_p3 = scmp.lt.u32.totalorder %s365_s30, %s533_s3 }
  0x27   :  { %p371_p4 = pnand %p369_p3, %p366_p2 }
  0x29   :  { %374 = shalt.err (!%p371_p4)
}
  0x2a   :  { %s375_s14 = scalar_lea.vmem %s46_s18, 512  ;;  %p380_p6 = scmp.lt.s32.totalorder %s46_s18, %s46_s18 }
  0x2b   :  { %p376_p5 = scmp.ne.s32.totalorder %s46_s18, %s375_s14  ;;  %p381_p7 = scmp.lt.s32.totalorder %s375_s14, %s375_s14 }
  0x2d   :  { %p382_p8 = por %p381_p7, %p380_p6 }
  0x2f   :  { %p383_p9 = pnand %p382_p8, %p376_p5 }
  0x31   :  { %386 = shalt.err (!%p383_p9)
}
  0x32   :  { %51 = dma.hbm_to_vmem [thread:$0]  %s533_s3, 512, %s46_s18, [#allocation7], %s416_s11, %s416_s11, %s417_s12  }
  0x33   :  { %409 = dma.done.wait [#allocation4], 64  }
  0x34   :  { %410 = vsyncadd [#allocation4], 4294967232 }
  0x35   :  { %411 = dma.done.wait [#allocation7], 704  }
  0x36   :  { %412 = vsyncadd [#allocation7], 4294966592  ;;  %v420_v0 = vmov 0.0   ;;  %vm421_vm0 = vmmov 0   ;;  %v315_v1 = vld [vmem:[#allocation6] sm:$0xff]   ;;  %vm85_vm1 = vcmask 1041408   ;;  %v243_v29 = vlaneseq }
  0x37   :  { %287 = vmatprep.subr.bf16.mxu0 %v420_v0  ;;  %291 = vmatprep.mubr.msk.bf16.mxu0 %vm421_vm0, %v420_v0  ;;  %v316_v2 = vld [vmem:[#allocation6 + $0x8] ss:$0 sps:$4 sm:$0x33]   ;;  %v317_v3 = vld [vmem:[#allocation8] sm:$0xff]   ;;  %v318_v5 = vld [vmem:[#allocation8 + $0x8] sm:$0xff]   ;;  %vm81_vm2 = vcmask 162816   ;;  %v240_v32 = vstv %s536_s6 }
  0x38   :  { %295 = vmatprep.subr.bf16.mxu1 %v420_v0  ;;  %303 = vmatprep.mubr.msk.bf16.mxu1 %vm421_vm0, %v420_v0  ;;  %v87_v4 = vsel %vm85_vm1, %v316_v2, 0  ;;  %v68_v6 = vld [vmem:[#allocation3] sm:$0xf]  ;;  %v320_v8 = vld [vmem:[#allocation8 + $0x18] sm:$0xff]   ;;  %vm175_vm3 = vcmask 523264   ;;  %v244_v30 = vand.u32 127, %v243_v29 }
  0x39   :  { %288 = vmatpush3.bf16.msra.mxu0 %v315_v1  ;;  %296 = vmatpush3.bf16.msra.mxu1 %v317_v3  ;;  %v319_v7 = vld [vmem:[#allocation8 + $0x10] sm:$0xff]   ;;  %v246_v31 = vshrl.u32 %v243_v29, 7  ;;  %vm250_vm4 = vcmask 57344  }
  0x3a   :  { %289 = vmatprep.subr.bf16.mxu0 %v420_v0  ;;  %297 = vmatprep.subr.bf16.mxu1 %v420_v0  ;;  %v271_v9 = vld [vmem:[%s532_s2] ss:$0 sm:$0xff] }
  0x3b   :  { %v277_v19 = vld [vmem:[%s534_s4] ss:$0 sm:$0xff]  ;;  %v247_v33 = vsub.s32 %v244_v30, %v246_v31  ;;  %s422_s4 = smov [#allocation9]  }
  0x3c   :  { %v278_v25 = vld [vmem:[%s535_s5] ss:$0 sm:$0xff]  ;;  %s258_s20 = sshll.u32 %s422_s4, 4  ;;  %s259_s20 = int_to_ptr.vmem [resolvable:$true] %s258_s20 }
  0x3d   :  { %290 = vmatpush3.bf16.msra.mxu0 %v87_v4  ;;  %298 = vmatpush3.bf16.msra.mxu1 %v318_v5  ;;  %s387_s5 = scalar_lea.vmem %s259_s20, 16  ;;  %s391_s21 = scalar_lea.vmem %s259_s20, 32 }
  0x3e   :  { %299 = vmatprep.subr.bf16.mxu1 %v420_v0  ;;  %p388_p10 = scmp.ne.s32.totalorder %s259_s20, %s387_s5  ;;  %p392_p11 = scmp.lt.s32.totalorder %s259_s20, %s259_s20 }
  0x3f   :  { %p393_p12 = scmp.lt.s32.totalorder %s391_s21, %s387_s5 }
  0x40   :  { %292 = vmatmul.mubr.msk.bf16.vlgmr.msra.gmra.mrb[0].mxu0 %vm81_vm2, %v68_v6 }
  0x41   :  { %300 = vmatpush3.bf16.msra.mxu1 %v319_v7  ;;  %p394_p13 = por %p393_p12, %p392_p11 }
  0x42   :  { %301 = vmatprep.subr.bf16.mxu1 %v420_v0 }
  0x43   :  { %p395_p0 = pnand %p394_p13, %p388_p10 }
  0x45   :  { %302 = vmatpush3.bf16.msra.mxu1 %v320_v8 }
 0x113   :  { %v123_v10 = vpop.f32.mrb[0].mxu0 }
 0x114   :  { %v136_v11 = vadd.f32 %v271_v9, %v123_v10  ;;  %172 = vrot.lane.b32.xlu0 %v123_v10, %s416_s11  ;;  %v293_v12 = vpop.f32.mrb[1].mxu0 }
 0x115   :  { %v126_v13 = vpop.f32.mrb[2].mxu0 }
 0x116   :  { %v137_v14 = vmax.f32 %v136_v11, 0.0  ;;  %v294_v15 = vpop.f32.mrb[3].mxu0 }
 0x118   :  { %v138_v16 = vpack.c.bf16 %v137_v14, %v137_v14 }
 0x11a   :  { %304 = vmatmul.mubr.msk.bf16.vlgmr.msra.gmra.mrb[0].mxu1 %vm175_vm3, %v138_v16 }
 0x186   :  { %v173_v17 = vpop.permute.xlu0 %172 }
 0x1ed   :  { %v213_v18 = vpop.f32.mrb[0].mxu1 }
 0x1ee   :  { %v214_v20 = vadd.f32 %v213_v18, %v173_v17  ;;  %v305_v21 = vpop.f32.mrb[1].mxu1 }
 0x1ef   :  { %v216_v22 = vpop.f32.mrb[2].mxu1 }
 0x1f0   :  { %v226_v23 = vadd.f32 %v277_v19, %v214_v20  ;;  %v306_v24 = vpop.f32.mrb[3].mxu1 }
 0x1f2   :  { %v227_v26 = vmax.f32 %v226_v23, 0.0 }
 0x1f4   :  { %v235_v27 = vmul.f32 %v278_v25, %v227_v26 }
 0x1f6   :  { %v236_v28 = vsel %vm175_vm3, %v235_v27, 0.0 }
 0x1f7   :  { %237 = vadd.xlane.f32.xlu0 %v236_v28 }
 0x284   :  { %v238_v34 = vpop.xlane.xlu0 %237 }
 0x285   :  { %v241_v35 = vadd.f32 %v240_v32, %v238_v34 }
 0x287   :  { %v248_v36 = vrot.slane %v241_v35, %v247_v33 }
 0x289   :  { %251 = vst.msk [vmem:[#allocation9] sm:$0x1] %vm250_vm4, %v248_v36 }
 0x28a   :  { %398 = shalt.err (!%p395_p0)
}
 0x28b   :  { %s399_s6 = scalar_lea.hbm %s537_s7, 16 }
 0x28c   :  { %p400_p1 = scmp.ne.s32.totalorder %s537_s7, %s399_s6  ;;  %p403_p2 = scmp.lt.u32.totalorder %s399_s6, %s537_s7 }
 0x28e   :  { %p405_p3 = pnand %p403_p2, %p400_p1 }
 0x290   :  { %408 = shalt.err (!%p405_p3)
}
 0x291   :  { %261 = dma.vmem_to_hbm [thread:$0]  %s259_s20, 16, %s537_s7, [#allocation5]  }
 0x292   :  { %413 = dma.done.wait [#allocation5], 16  }
 0x293   :  { %414 = vsyncadd [#allocation5], 4294967280 }
 0x294   :  { %265 = vsyncpa [#allocation4], 1 }
 0x295   :  { %266 = vsyncpa [#allocation7], 1 }
 0x296   :  { %267 = vsyncpa [#allocation5], 1 }

</bundles_post_ra>
